<compile_context>
chip_gen: v6e
topology: v6e:2x2x1
jax: 0.10.0
libtpu: 0.0.40
codegen_flags: <defaults>
</compile_context>

<pallas_src>
import functools

import jax
import jax.numpy as jnp
from jax.experimental import pallas as pl
from jax.experimental.pallas import tpu as pltpu

IN_DIM, HID_DIM, OUT_DIM = 10, 5, 2
DROP_P = 0.5  # keep prob = 0.5 -> mask is the hash's sign bit


def _u32(x):
    return jnp.uint32(x & 0xFFFFFFFF)


def _keep_mask_half(shape, seed_u32, tile_u32):
    """Bernoulli(0.5) keep-mask from a counter-based hash (murmur3 fmix32).

    Seeded by (seed, tile_id, row, lane) so every batch tile gets a distinct,
    deterministic mask.  Uses only 32-bit VPU integer ops (mul/xor/shift) and a
    `== 0` compare on the top bit; no unsigned `<`, no stateful PRNG.
    """
    r = jax.lax.broadcasted_iota(jnp.int32, shape, 0).astype(jnp.uint32)
    c = jax.lax.broadcasted_iota(jnp.int32, shape, 1).astype(jnp.uint32)
    v = (r * _u32(0x9E3779B1)) ^ (c * _u32(0x85EBCA77))
    v = v + seed_u32 * _u32(0xC2B2AE3D) + tile_u32 * _u32(0x27D4EB2F)
    v = v ^ (v >> 16)
    v = v * _u32(0x85EBCA6B)
    v = v ^ (v >> 13)
    v = v * _u32(0xC2B2AE35)
    v = v ^ (v >> 16)
    # keep iff top bit == 0  <=>  v < 2**31  <=>  keep prob = 0.5 = 1 - DROP_P
    return (v >> 31) == _u32(0)
    # TODO(synk): for a general p != 0.5 compare the hash against
    #             round((1-p) * 2**32) and scale survivors by 1/(1-p).


def _mlp_dropout_kernel(seed_ref, x_ref, w1_ref, b1_ref, w2_ref, b2_ref,
                        o_ref, *, train):
    # fc1 + relu.  x / w1 may be bf16 on the HBM side; accumulate in f32 so the
    # elementwise section is always f32 (safe on v5e's non-bf16 VPU).
    h = jnp.dot(w1_ref[...], x_ref[...],
                preferred_element_type=jnp.float32) + b1_ref[...]
    h = jnp.maximum(h, 0.0)

    if train:
        # Inverted dropout, p = 0.5: keep w.p. 0.5, survivors scaled by
        # 1/(1-p) = 2 (h + h avoids an extra VPU multiply).  Mixing in
        # pl.program_id(0) decorrelates masks across batch tiles.
        keep = _keep_mask_half(h.shape,
                               seed_ref[0].astype(jnp.uint32),
                               pl.program_id(0).astype(jnp.uint32))
        h = jnp.where(keep, h + h, 0.0)

    # fc2 (upcast weights in-kernel; h is already f32)
    out = jnp.dot(w2_ref[...].astype(jnp.float32), h,
                  preferred_element_type=jnp.float32) + b2_ref[...]
    o_ref[...] = out.astype(o_ref.dtype)


def simple_nn_dropout(x, params, seed, train=True, *,
                      tile_b=1024, input_dtype=jnp.float32):
    """Fused MLP+dropout forward.  x: (B, 10) -> (B, 2) float32.

    params use the PyTorch layout: w1 (5,10), b1 (5,), w2 (2,5), b2 (2,).
    input_dtype=jnp.bfloat16 halves HBM read traffic on v6e/v7x.
    """
    B = x.shape[0]
    w1, b1, w2, b2 = params

    # Lane-aligned tile; shrink to the batch so small batches don't pay for a
    # full 1024-lane tile of padded compute.
    tile_b = max(128, (tile_b // 128) * 128)
    tile_b = min(tile_b, pl.cdiv(B, 128) * 128)
    n_tiles = pl.cdiv(B, tile_b)
    B_pad = n_tiles * tile_b

    # Transposed, batch-on-lanes layout; pad the batch to whole tiles.
    x_t = jnp.zeros((IN_DIM, B_pad), input_dtype).at[:, :B].set(
        x.astype(input_dtype).T)

    w1c = w1.astype(input_dtype)
    w2c = w2.astype(input_dtype)
    b1c = b1.reshape(HID_DIM, 1).astype(jnp.float32)
    b2c = b2.reshape(OUT_DIM, 1).astype(jnp.float32)

    kernel = functools.partial(_mlp_dropout_kernel, train=train)

    grid_spec = pltpu.PrefetchScalarGridSpec(
        num_scalar_prefetch=1,               # seed scalar -> SMEM
        grid=(n_tiles,),
        in_specs=[
            pl.BlockSpec((IN_DIM, tile_b),   lambda i, seed: (0, i)),  # x^T tile
            pl.BlockSpec((HID_DIM, IN_DIM),  lambda i, seed: (0, 0)),  # w1 (resident)
            pl.BlockSpec((HID_DIM, 1),       lambda i, seed: (0, 0)),  # b1
            pl.BlockSpec((OUT_DIM, HID_DIM), lambda i, seed: (0, 0)),  # w2
            pl.BlockSpec((OUT_DIM, 1),       lambda i, seed: (0, 0)),  # b2
        ],
        out_specs=pl.BlockSpec((OUT_DIM, tile_b), lambda i, seed: (0, i)),
    )

    out_t = pl.pallas_call(
        kernel,
        out_shape=jax.ShapeDtypeStruct((OUT_DIM, B_pad), jnp.float32),
        grid_spec=grid_spec,
        compiler_params=pltpu.CompilerParams(
            dimension_semantics=("parallel",)),   # v7x: split tiles over 2 TCs
    )(jnp.asarray([seed], dtype=jnp.int32), x_t, w1c, b1c, w2c, b2c)

    return out_t[:, :B].T


def init_params(key):
    """Deterministic init mimicking torch.nn.Linear defaults
    (uniform(-1/sqrt(fan_in), 1/sqrt(fan_in))), stored in PyTorch (out, in) layout."""
    k1, k2, k3, k4 = jax.random.split(key, 4)
    bound1 = 1.0 / (IN_DIM ** 0.5)
    bound2 = 1.0 / (HID_DIM ** 0.5)
    w1 = jax.random.uniform(k1, (HID_DIM, IN_DIM), jnp.float32, -bound1, bound1)
    b1 = jax.random.uniform(k2, (HID_DIM,), jnp.float32, -bound1, bound1)
    w2 = jax.random.uniform(k3, (OUT_DIM, HID_DIM), jnp.float32, -bound2, bound2)
    b2 = jax.random.uniform(k4, (OUT_DIM,), jnp.float32, -bound2, bound2)
    return w1, b1, w2, b2


if __name__ == "__main__":
    root = jax.random.PRNGKey(0)
    k_x, k_p = jax.random.split(root)

    B = 8
    x = jax.random.normal(k_x, (B, IN_DIM), dtype=jnp.float32)
    params = init_params(k_p)

    # training-mode forward (dropout active), matching nn.Module default mode
    out_train = simple_nn_dropout(x, params, seed=42, train=True)
    jax.block_until_ready(out_train)

    # eval-mode forward (dropout is identity)
    out_eval = simple_nn_dropout(x, params, seed=0, train=False)
    jax.block_until_ready(out_eval)

    # bf16-on-HBM variant (perf path for v6e/v7x; accumulation stays f32)
    out_bf16 = simple_nn_dropout(x, params, seed=7, train=True,
                                 input_dtype=jnp.bfloat16)
    jax.block_until_ready(out_bf16)

    assert out_train.shape == (B, OUT_DIM)
    assert out_eval.shape == (B, OUT_DIM)
    assert out_bf16.shape == (B, OUT_DIM)

    # sanity: eval mode must match the plain (dropout-free) reference
    w1, b1, w2, b2 = params
    ref = jnp.maximum(x @ w1.T + b1, 0.0) @ w2.T + b2
    assert jnp.allclose(out_eval, ref, atol=5e-2, rtol=5e-2)

    print("KERNEL_OK")
</pallas_src>

<mosaic_0001>
module attributes {stable_mosaic.version = 11 : i64} {
  func.func @_mlp_dropout_kernel(%arg0: i32, %arg1: memref<1xi32, #tpu.memory_space<smem>>, %arg2: memref<10x128xf32, #tpu.memory_space<vmem>>, %arg3: memref<5x10xf32, #tpu.memory_space<vmem>>, %arg4: memref<5x1xf32, #tpu.memory_space<vmem>>, %arg5: memref<2x5xf32, #tpu.memory_space<vmem>>, %arg6: memref<2x1xf32, #tpu.memory_space<vmem>>, %arg7: memref<2x128xf32, #tpu.memory_space<vmem>>) attributes {dimension_semantics = [#tpu.dimension_semantics<parallel>], iteration_bounds = array<i64: 1>, scalar_prefetch = 1 : i64, scratch_operands = 0 : i64, tpu.core_type = #tpu.core_type<tc>, window_params = [{transform_indices = @transform_0, window_bounds = array<i64: 10, 128>}, {pipeline_mode = #tpu.pipeline_mode<synchronous>, transform_indices = @transform_1, window_bounds = array<i64: 5, 10>}, {pipeline_mode = #tpu.pipeline_mode<synchronous>, transform_indices = @transform_2, window_bounds = array<i64: 5, 1>}, {pipeline_mode = #tpu.pipeline_mode<synchronous>, transform_indices = @transform_3, window_bounds = array<i64: 2, 5>}, {pipeline_mode = #tpu.pipeline_mode<synchronous>, transform_indices = @transform_4, window_bounds = array<i64: 2, 1>}, {transform_indices = @transform_5, window_bounds = array<i64: 2, 128>}]} {
    %c0 = arith.constant 0 : index
    %c0_0 = arith.constant 0 : index
    %0 = vector.load %arg3[%c0, %c0_0] : memref<5x10xf32, #tpu.memory_space<vmem>>, vector<5x10xf32>
    %c0_1 = arith.constant 0 : index
    %c0_2 = arith.constant 0 : index
    %1 = vector.load %arg2[%c0_1, %c0_2] : memref<10x128xf32, #tpu.memory_space<vmem>>, vector<10x128xf32>
    %cst = arith.constant dense<0.000000e+00> : vector<5x128xf32>
    %2 = tpu.matmul %0, %1, %cst {dimension_numbers = #tpu.dot_dimension_numbers<[1], [0], [0], [1], [0, 0, 1, 1], [], []>} : vector<5x10xf32>, vector<10x128xf32>, vector<5x128xf32> -> vector<5x128xf32>
    %c0_3 = arith.constant 0 : index
    %c0_4 = arith.constant 0 : index
    %3 = vector.load %arg4[%c0_3, %c0_4] : memref<5x1xf32, #tpu.memory_space<vmem>>, vector<5x1xf32>
    %4 = vector.broadcast %3 : vector<5x1xf32> to vector<5x128xf32>
    %5 = arith.addf %2, %4 : vector<5x128xf32>
    %cst_5 = arith.constant 0.000000e+00 : f32
    %6 = vector.broadcast %cst_5 : f32 to vector<5x128xf32>
    %7 = arith.maximumf %5, %6 : vector<5x128xf32>
    %c0_6 = arith.constant 0 : index
    %8 = memref.load %arg1[%c0_6] : memref<1xi32, #tpu.memory_space<smem>>
    %9 = tpu.iota {dimensions = array<i32: 0>} : vector<5x128xi32>
    %10 = tpu.iota {dimensions = array<i32: 1>} : vector<5x128xi32>
    %c-1640531535_i32 = arith.constant -1640531535 : i32
    %11 = vector.broadcast %c-1640531535_i32 : i32 to vector<5x128xi32>
    %12 = arith.muli %9, %11 : vector<5x128xi32>
    %c-2048144777_i32 = arith.constant -2048144777 : i32
    %13 = vector.broadcast %c-2048144777_i32 : i32 to vector<5x128xi32>
    %14 = arith.muli %10, %13 : vector<5x128xi32>
    %15 = arith.xori %12, %14 : vector<5x128xi32>
    %c-1028477379_i32 = arith.constant -1028477379 : i32
    %16 = arith.muli %8, %c-1028477379_i32 : i32
    %17 = vector.broadcast %16 : i32 to vector<5x128xi32>
    %18 = arith.addi %15, %17 : vector<5x128xi32>
    %c668265263_i32 = arith.constant 668265263 : i32
    %19 = arith.muli %arg0, %c668265263_i32 : i32
    %20 = vector.broadcast %19 : i32 to vector<5x128xi32>
    %21 = arith.addi %18, %20 : vector<5x128xi32>
    %c16_i32 = arith.constant 16 : i32
    %22 = vector.broadcast %c16_i32 : i32 to vector<5x128xi32>
    %23 = arith.shrui %21, %22 : vector<5x128xi32>
    %24 = arith.xori %21, %23 : vector<5x128xi32>
    %c-2048144789_i32 = arith.constant -2048144789 : i32
    %25 = vector.broadcast %c-2048144789_i32 : i32 to vector<5x128xi32>
    %26 = arith.muli %24, %25 : vector<5x128xi32>
    %c13_i32 = arith.constant 13 : i32
    %27 = vector.broadcast %c13_i32 : i32 to vector<5x128xi32>
    %28 = arith.shrui %26, %27 : vector<5x128xi32>
    %29 = arith.xori %26, %28 : vector<5x128xi32>
    %c-1028477387_i32 = arith.constant -1028477387 : i32
    %30 = vector.broadcast %c-1028477387_i32 : i32 to vector<5x128xi32>
    %31 = arith.muli %29, %30 : vector<5x128xi32>
    %c16_i32_7 = arith.constant 16 : i32
    %32 = vector.broadcast %c16_i32_7 : i32 to vector<5x128xi32>
    %33 = arith.shrui %31, %32 : vector<5x128xi32>
    %34 = arith.xori %31, %33 : vector<5x128xi32>
    %c31_i32 = arith.constant 31 : i32
    %35 = vector.broadcast %c31_i32 : i32 to vector<5x128xi32>
    %36 = arith.shrui %34, %35 : vector<5x128xi32>
    %c0_i32 = arith.constant 0 : i32
    %37 = vector.broadcast %c0_i32 : i32 to vector<5x128xi32>
    %38 = arith.cmpi eq, %36, %37 : vector<5x128xi32>
    %39 = arith.addf %7, %7 : vector<5x128xf32>
    %cst_8 = arith.constant 0.000000e+00 : f32
    %40 = vector.broadcast %cst_8 : f32 to vector<5x128xf32>
    %41 = arith.select %38, %39, %40 : vector<5x128xi1>, vector<5x128xf32>
    %c0_9 = arith.constant 0 : index
    %c0_10 = arith.constant 0 : index
    %42 = vector.load %arg5[%c0_9, %c0_10] : memref<2x5xf32, #tpu.memory_space<vmem>>, vector<2x5xf32>
    %cst_11 = arith.constant dense<0.000000e+00> : vector<2x128xf32>
    %43 = tpu.matmul %42, %41, %cst_11 {dimension_numbers = #tpu.dot_dimension_numbers<[1], [0], [0], [1], [0, 0, 1, 1], [], []>} : vector<2x5xf32>, vector<5x128xf32>, vector<2x128xf32> -> vector<2x128xf32>
    %c0_12 = arith.constant 0 : index
    %c0_13 = arith.constant 0 : index
    %44 = vector.load %arg6[%c0_12, %c0_13] : memref<2x1xf32, #tpu.memory_space<vmem>>, vector<2x1xf32>
    %45 = vector.broadcast %44 : vector<2x1xf32> to vector<2x128xf32>
    %46 = arith.addf %43, %45 : vector<2x128xf32>
    %c0_14 = arith.constant 0 : index
    %c0_15 = arith.constant 0 : index
    %47 = vector.load %arg7[%c0_14, %c0_15] : memref<2x128xf32, #tpu.memory_space<vmem>>, vector<2x128xf32>
    tpu.vector_store %arg7[%c0_14, %c0_15], %46 {strides = array<i32>} : memref<2x128xf32, #tpu.memory_space<vmem>>, vector<2x128xf32>,
    return
  }
  func.func @transform_0(%arg0: i32, %arg1: memref<1xi32, #tpu.memory_space<smem>>) -> (i32, i32) {
    %c0_i32 = arith.constant 0 : i32
    %c0_i32_0 = arith.constant 0 : i32
    return %c0_i32, %arg0 : i32, i32
  }
  func.func @transform_1(%arg0: i32, %arg1: memref<1xi32, #tpu.memory_space<smem>>) -> (i32, i32) {
    %c0_i32 = arith.constant 0 : i32
    %c0_i32_0 = arith.constant 0 : i32
    %c0_i32_1 = arith.constant 0 : i32
    return %c0_i32, %c0_i32_0 : i32, i32
  }
  func.func @transform_2(%arg0: i32, %arg1: memref<1xi32, #tpu.memory_space<smem>>) -> (i32, i32) {
    %c0_i32 = arith.constant 0 : i32
    %c0_i32_0 = arith.constant 0 : i32
    %c0_i32_1 = arith.constant 0 : i32
    return %c0_i32, %c0_i32_0 : i32, i32
  }
  func.func @transform_3(%arg0: i32, %arg1: memref<1xi32, #tpu.memory_space<smem>>) -> (i32, i32) {
    %c0_i32 = arith.constant 0 : i32
    %c0_i32_0 = arith.constant 0 : i32
    %c0_i32_1 = arith.constant 0 : i32
    return %c0_i32, %c0_i32_0 : i32, i32
  }
  func.func @transform_4(%arg0: i32, %arg1: memref<1xi32, #tpu.memory_space<smem>>) -> (i32, i32) {
    %c0_i32 = arith.constant 0 : i32
    %c0_i32_0 = arith.constant 0 : i32
    %c0_i32_1 = arith.constant 0 : i32
    return %c0_i32, %c0_i32_0 : i32, i32
  }
  func.func @transform_5(%arg0: i32, %arg1: memref<1xi32, #tpu.memory_space<smem>>) -> (i32, i32) {
    %c0_i32 = arith.constant 0 : i32
    %c0_i32_0 = arith.constant 0 : i32
    return %c0_i32, %arg0 : i32, i32
  }
}

</mosaic_0001>

<bundles_post_ra>
// kernel: tpu_custom_call.1
= control target key start
LH: loop header
LB: loop body
LE: loop exit
PB: predicated region body
PF: predicated region fallthrough
CT: control target
= control target key end

     0   :  { %12 = vsyncpa [#allocation5], 0  ;;  %s388_s0 = inlined_call_operand.<no memory space> [shape: s32[1], index: 0, kind: input, shape index: {}]   ;;  %s389_s1 = inlined_call_operand.hbm [shape: f32[10,128], index: 1, kind: input, shape index: {}]   ;;  %s390_s2 = inlined_call_operand.vmem [shape: f32[5,10], index: 2, kind: input, shape index: {}]   ;;  %s391_s3 = inlined_call_operand.vmem [shape: f32[5,1], index: 3, kind: input, shape index: {}]   ;;  %s392_s4 = inlined_call_operand.vmem [shape: f32[2,5], index: 4, kind: input, shape index: {}]   ;;  %s393_s5 = inlined_call_operand.vmem [shape: f32[2,1], index: 5, kind: input, shape index: {}]   ;;  %s394_s6 = inlined_call_operand.hbm [shape: f32[2,128], index: 6, kind: output, shape index: {}]  }
   0x1   :  { %13 = vsyncpa [#allocation6], 0  ;;  %s325_s21 = smov [#allocation4]  }
   0x2   :  { %s19_s22 = sshll.u32 %s325_s21, 4  ;;  %s20_s22 = int_to_ptr.vmem [resolvable:$true] %s19_s22 }
   0x3   :  { %s289_s23 = scalar_lea.vmem %s20_s22, 256  ;;  %p294_p1 = scmp.lt.s32.totalorder %s20_s22, %s20_s22 }
   0x4   :  { %p290_p0 = scmp.ne.s32.totalorder %s20_s22, %s289_s23  ;;  %p295_p2 = scmp.lt.s32.totalorder %s289_s23, %s289_s23 }
   0x6   :  { %p296_p3 = por %p295_p2, %p294_p1 }
   0x8   :  { %p297_p4 = pnand %p296_p3, %p290_p0 }
   0xa   :  { %300 = shalt.err (!%p297_p4)
}
   0xb   :  { %s326_s24 = smov 128   ;;  %s327_s25 = smov 8  }
   0xc   :  { %25 = dma.hbm_to_vmem [thread:$0]  %s389_s1, 256, %s20_s22, [#allocation5], %s326_s24, %s326_s24, %s327_s25  }
   0xd   :  { %321 = dma.done.wait [#allocation5], 256  }
   0xe   :  { %322 = vsyncadd [#allocation5], 4294967040  ;;  %v328_v0 = vmov 0.0   ;;  %vm329_vm0 = vmmov 0   ;;  %v330_v1 = vmov 0   ;;  %vm50_vm1 = vcmask 1041408  }
   0xf   :  { %261 = vmatprep.subr.mxu0 %v328_v0  ;;  %265 = vmatprep.mubr.msk.f32.mxu0 %vm329_vm0, %v328_v0  ;;  %v39_v2 = vld [vmem:[#allocation4 + $0x8] sm:$0x3]  ;;  %v38_v3 = vld [vmem:[#allocation4] sm:$0xff]  ;;  %vm46_vm2 = vcmask 80896   ;;  %v126_v7 = vlaneseq  ;;  %s133_s10 = smul.u32 3266489917, %s388_s0 }
  0x10   :  { %280 = vset.pattern.permute.xlu0 %v330_v1  ;;  %268 = vmatprep.subr.mxu1 %v328_v0  ;;  %v37_v4 = vld [vmem:[%s390_s2] sm:$0x1f]  ;;  %vm162_vm4 = vcmask 1044480   ;;  %vm158_vm5 = vcmask 39936  }
  0x11   :  { %270 = vmatprep.mubr.msk.f32.mxu1 %vm329_vm0, %v328_v0  ;;  %262 = vmatpush3.msk.msra.mxu0 %vm50_vm1, %v39_v2  ;;  %v40_v5 = vld [vmem:[%s391_s3] sm:$0x1f]  ;;  %v127_v8 = vshrl.u32 %v126_v7, 7  ;;  %v129_v9 = vand.u32 127, %v126_v7  ;;  %v134_v13 = vstv %s133_s10 }
  0x12   :  { %263 = vmatprep.subr.mxu0 %v328_v0  ;;  %43 = vperm.xlu0 %280, %v40_v5   ;;  %v152_v6 = vld [vmem:[%s393_s5] sm:$0x3]  ;;  %s331_s5 = smov [#allocation7]  }
  0x13   :  { %264 = vmatpush3.msra.mxu0 %v38_v3  ;;  %v130_v10 = vmul.u32 2654435761, %v127_v8  ;;  %v131_v11 = vmul.u32 2246822519, %v129_v9  ;;  %v151_v30 = vld [vmem:[%s392_s4] sm:$0x3] }
  0x14   :  { %266 = vmatmul.mubr.msk.f32.vlgmr.msra.gmra.mxu0 %vm46_vm2, %v37_v4  ;;  %s243_s11 = sshll.u32 %s331_s5, 4  ;;  %s244_s11 = int_to_ptr.vmem [resolvable:$true] %s243_s11 }
  0x15   :  { %v132_v12 = vxor.u32 %v131_v11, %v130_v10  ;;  %s301_s12 = scalar_lea.vmem %s244_s11, 32  ;;  %p306_p6 = scmp.lt.s32.totalorder %s244_s11, %s244_s11 }
  0x16   :  { %155 = vperm.xlu0 %280, %v152_v6   ;;  %p302_p5 = scmp.ne.s32.totalorder %s244_s11, %s301_s12  ;;  %p307_p7 = scmp.lt.s32.totalorder %s301_s12, %s301_s12 }
  0x17   :  { %v135_v14 = vadd.s32 %v134_v13, %v132_v12 }
  0x18   :  { %p308_p8 = por %p307_p7, %p306_p6 }
  0x19   :  { %v139_v15 = vshrl.u32 %v135_v14, 16 }
  0x1a   :  { %p309_p9 = pnand %p308_p8, %p302_p5 }
  0x1b   :  { %v140_v16 = vxor.u32 %v139_v15, %v135_v14 }
  0x1d   :  { %v141_v17 = vmul.u32 2246822507, %v140_v16 }
  0x1f   :  { %v142_v18 = vshrl.u32 %v141_v17, 13 }
  0x21   :  { %v143_v19 = vxor.u32 %v142_v18, %v141_v17 }
  0x23   :  { %v144_v20 = vmul.u32 3266489909, %v143_v19 }
  0x25   :  { %v145_v21 = vshrl.u32 %v144_v20, 16 }
  0x27   :  { %v146_v22 = vxor.u32 %v145_v21, %v144_v20 }
  0x29   :  { %v147_v25 = vshrl.u32 %v146_v22, 31 }
  0x2b   :  { %vm148_vm3 = vcmp.eq.s32.totalorder %v147_v25, 0 }
  0x8d   :  { %v44_v23 = vpop.permute.xlu0 %43 }
  0x91   :  { %v156_v32 = vpop.permute.xlu0 %155 }
  0xd4   :  { %v120_v24 = vpop.f32.mrf.mxu0 }
  0xd5   :  { %v121_v26 = vadd.f32 %v120_v24, %v44_v23 }
  0xd6   :  { %v267_v27 = vpop.f32.mrf.mxu0 }
  0xd7   :  { %v124_v28 = vmax.f32 %v121_v26, 0.0 }
  0xd9   :  { %v149_v29 = vadd.f32 %v124_v28, %v124_v28 }
  0xdb   :  { %v150_v31 = vsel %vm148_vm3, %v149_v29, 0.0 }
  0xdc   :  { %269 = vmatpush3.msk.msra.mxu1 %vm162_vm4, %v150_v31 }
  0xdd   :  { %271 = vmatmul.mubr.msk.f32.vlgmr.msra.gmra.mxu1 %vm158_vm5, %v151_v30 }
 0x19d   :  { %v232_v33 = vpop.f32.mrf.mxu1 }
 0x19e   :  { %v233_v34 = vadd.f32 %v232_v33, %v156_v32 }
 0x19f   :  { %v272_v35 = vpop.f32.mrf.mxu1 }
 0x1a0   :  { %236 = vst [vmem:[#allocation7] sm:$0x3] %v233_v34 }
 0x1a1   :  { %312 = shalt.err (!%p309_p9)
}
 0x1a2   :  { %246 = dma.vmem_to_hbm [thread:$0]  %s244_s11, 32, %s394_s6, [#allocation6]  }
 0x1a3   :  { %323 = dma.done.wait [#allocation6], 32  }
 0x1a4   :  { %324 = vsyncadd [#allocation6], 4294967264 }
 0x1a5   :  { %250 = vsyncpa [#allocation5], 1 }
 0x1a6   :  { %251 = vsyncpa [#allocation6], 1 }

</bundles_post_ra>
